<compile_context>
chip_gen: v7x
topology: tpu7x:2x2x1
jax: 0.10.0
libtpu: 0.0.40
codegen_flags: <defaults>
</compile_context>

<pallas_src>
import functools

import jax
import jax.numpy as jnp
from jax.experimental import pallas as pl
from jax.experimental.pallas import tpu as pltpu

_LANES = 128


def _round_up(x, m):
    return (x + m - 1) // m * m


# ----------------------------- Pallas kernel -------------------------------
def _gemm_bias_act_kernel(x_ref, w_ref, b_ref, o_ref, *, apply_relu):
    # x_ref: (TR, K)   im2col rows (activations), K = 9*Cin
    # w_ref: (K, CP)   flattened 3x3 weights, Cout zero-padded to CP (mult of 128)
    # b_ref: (1, CP)   f32 bias, zero-padded
    # o_ref: (TR, CP)  lane-dense output rows
    acc = jnp.dot(x_ref[...], w_ref[...], preferred_element_type=jnp.float32)
    acc = acc + b_ref[...]                      # lane-dense VPU bias add
    if apply_relu:
        acc = jnp.maximum(acc, 0.0)             # fused ReLU
    o_ref[...] = acc.astype(o_ref.dtype)        # unmasked, lane-dense store


def _conv_gemm(patch, w_flat, b_pad, *, apply_relu, out_dtype, tile_rows):
    """Row-tiled (rows, K) @ (K, CP) + bias (+ReLU) on the MXU."""
    R, K = patch.shape
    CP = w_flat.shape[1]
    tile_rows = min(tile_rows, _round_up(R, 16))
    Rp = _round_up(R, tile_rows)
    if Rp != R:
        patch = jnp.pad(patch, ((0, Rp - R), (0, 0)))
    grid = (Rp // tile_rows,)

    kernel = functools.partial(_gemm_bias_act_kernel, apply_relu=apply_relu)
    out = pl.pallas_call(
        kernel,
        out_shape=jax.ShapeDtypeStruct((Rp, CP), out_dtype),
        grid_spec=pltpu.PrefetchScalarGridSpec(
            num_scalar_prefetch=0,
            grid=grid,
            in_specs=[
                pl.BlockSpec((tile_rows, K), lambda r: (r, 0)),  # pipelined rows
                pl.BlockSpec((K, CP), lambda r: (0, 0)),         # resident weights
                pl.BlockSpec((1, CP), lambda r: (0, 0)),         # resident bias
            ],
            out_specs=pl.BlockSpec((tile_rows, CP), lambda r: (r, 0)),
        ),
        compiler_params=pltpu.CompilerParams(
            dimension_semantics=("parallel",)),
    )(patch, w_flat, b_pad)
    return out[:R]


# ----------------------------- conv wrapper ---------------------------------
def _im2col_3x3_reflect(x_nhwc):
    """Reflect-pad by 1 and gather the 9 taps -> (N*H*W, 9*Cin).

    Tap-major / channel-minor K ordering, matching the weight flattening
    (kh, kw, Cin, Cout) -> (9*Cin, Cout)."""
    N, H, W, C = x_nhwc.shape
    xp = jnp.pad(x_nhwc, ((0, 0), (1, 1), (1, 1), (0, 0)), mode="reflect")
    taps = [xp[:, ky:ky + H, kx:kx + W, :] for ky in range(3) for kx in range(3)]
    return jnp.concatenate(taps, axis=-1).reshape(N * H * W, 9 * C)


def conv2d_3x3_reflect(x_nhwc, w_oihw, b, *, apply_relu,
                       compute_dtype=jnp.float32, tile_rows=256):
    """3x3 conv, stride 1, 'same' reflect padding, fused bias + optional ReLU."""
    N, H, W, Cin = x_nhwc.shape
    Cout = w_oihw.shape[0]
    CP = _round_up(Cout, _LANES)          # lane-dense output channel count

    patch = _im2col_3x3_reflect(x_nhwc).astype(compute_dtype)
    # OIHW -> (kh, kw, Cin, Cout) -> (9*Cin, Cout); zero-pad Cout to CP lanes.
    w_flat = jnp.transpose(w_oihw, (2, 3, 1, 0)).reshape(9 * Cin, Cout)
    w_flat = jnp.pad(w_flat, ((0, 0), (0, CP - Cout))).astype(compute_dtype)
    b_pad = jnp.pad(b, (0, CP - Cout)).reshape(1, CP).astype(jnp.float32)

    y = _conv_gemm(patch, w_flat, b_pad, apply_relu=apply_relu,
                   out_dtype=x_nhwc.dtype, tile_rows=tile_rows)
    return y[:, :Cout].reshape(N, H, W, Cout)


# --------------------------- parameter setup --------------------------------
def _kaiming_normal_conv(key, cin, cout):
    # torch.nn.init.kaiming_normal_ defaults: fan_in mode, gain = sqrt(2)
    fan_in = cin * 3 * 3
    std = (2.0 / fan_in) ** 0.5
    w = jax.random.normal(key, (cout, cin, 3, 3), jnp.float32) * std
    b = jnp.zeros((cout,), jnp.float32)
    return w, b


def make_conv_block_params(key, in_channels, out_channels):
    if in_channels == 3:
        k0, k1, k2 = jax.random.split(key, 3)
        return {
            "conv0": _kaiming_normal_conv(k0, in_channels, 1),
            "conv1": _kaiming_normal_conv(k1, 1, out_channels),
            "conv2": _kaiming_normal_conv(k2, out_channels, out_channels),
        }
    k1, k2 = jax.random.split(key, 2)
    return {
        "conv1": _kaiming_normal_conv(k1, in_channels, out_channels),
        "conv2": _kaiming_normal_conv(k2, out_channels, out_channels),
    }


def conv_block_forward(x_nchw, params, in_channels, compute_dtype=jnp.float32):
    """ConvBlock.forward. Input/output are NCHW to match the PyTorch module."""
    x = jnp.transpose(x_nchw, (0, 2, 3, 1))  # NCHW -> NHWC (channels on lanes)
    if in_channels == 3:
        layers = [("conv0", False), ("conv1", True), ("conv2", True)]
    else:
        layers = [("conv1", True), ("conv2", True)]
    for name, relu in layers:
        w, b = params[name]
        x = conv2d_3x3_reflect(x, w, b, apply_relu=relu,
                               compute_dtype=compute_dtype)
    return jnp.transpose(x, (0, 3, 1, 2))  # NHWC -> NCHW


# ------------------------------ reference -----------------------------------
def _conv_ref(x_nchw, w_oihw, b, apply_relu):
    x_pad = jnp.pad(x_nchw, ((0, 0), (0, 0), (1, 1), (1, 1)), mode="reflect")
    y = jax.lax.conv_general_dilated(
        x_pad, w_oihw, window_strides=(1, 1), padding="VALID",
        dimension_numbers=("NCHW", "OIHW", "NCHW"))
    y = y + b[None, :, None, None]
    return jnp.maximum(y, 0.0) if apply_relu else y


def conv_block_ref(x_nchw, params, in_channels):
    x = x_nchw
    if in_channels == 3:
        x = _conv_ref(x, *params["conv0"], apply_relu=False)
        x = _conv_ref(x, *params["conv1"], apply_relu=True)
        x = _conv_ref(x, *params["conv2"], apply_relu=True)
    else:
        x = _conv_ref(x, *params["conv1"], apply_relu=True)
        x = _conv_ref(x, *params["conv2"], apply_relu=True)
    return x


# -------------------------------- main ---------------------------------------
if __name__ == "__main__":
    key = jax.random.PRNGKey(0)
    k_x, k_p, k_x3, k_p3 = jax.random.split(key, 4)

    fwd = jax.jit(conv_block_forward, static_argnums=(2, 3))

    # --- in_channels != 3 branch (conv1+relu, conv2+relu), f32 ---
    in_channels, out_channels = 4, 8
    x = jax.random.normal(k_x, (2, in_channels, 16, 16), jnp.float32)  # NCHW
    params = make_conv_block_params(k_p, in_channels, out_channels)
    out = jax.block_until_ready(fwd(x, params, in_channels, jnp.float32))
    ref = conv_block_ref(x, params, in_channels)
    assert out.shape == (2, out_channels, 16, 16)
    assert jnp.allclose(out, ref, atol=1e-4, rtol=1e-4), "f32 mismatch (4ch)"

    # --- in_channels == 3 branch (conv0, conv1+relu, conv2+relu), f32 ---
    x3 = jax.random.normal(k_x3, (2, 3, 16, 16), jnp.float32)
    params3 = make_conv_block_params(k_p3, 3, out_channels)
    out3 = jax.block_until_ready(fwd(x3, params3, 3, jnp.float32))
    ref3 = conv_block_ref(x3, params3, 3)
    assert out3.shape == (2, out_channels, 16, 16)
    assert jnp.allclose(out3, ref3, atol=1e-4, rtol=1e-4), "f32 mismatch (3ch)"

    # --- bf16 inputs/weights (v6e/v7x recommendation), f32 accumulation ---
    out_bf16 = jax.block_until_ready(fwd(x, params, in_channels, jnp.bfloat16))
    assert float(jnp.max(jnp.abs(out_bf16 - ref))) < 0.25, "bf16 path diverged"

    print("KERNEL_OK")
</pallas_src>

<mosaic_0001>
module attributes {stable_mosaic.version = 11 : i64} {
  func.func @_gemm_bias_act_kernel(%arg0: i32, %arg1: memref<256x36xf32, #tpu.memory_space<vmem>>, %arg2: memref<36x128xf32, #tpu.memory_space<vmem>>, %arg3: memref<1x128xf32, #tpu.memory_space<vmem>>, %arg4: memref<256x128xf32, #tpu.memory_space<vmem>>) attributes {dimension_semantics = [#tpu.dimension_semantics<parallel>], iteration_bounds = array<i64: 2>, scalar_prefetch = 0 : i64, scratch_operands = 0 : i64, tpu.core_type = #tpu.core_type<tc>, window_params = [{transform_indices = @transform_0, window_bounds = array<i64: 256, 36>}, {pipeline_mode = #tpu.pipeline_mode<synchronous>, transform_indices = @transform_1, window_bounds = array<i64: 36, 128>}, {pipeline_mode = #tpu.pipeline_mode<synchronous>, transform_indices = @transform_2, window_bounds = array<i64: 1, 128>}, {transform_indices = @transform_3, window_bounds = array<i64: 256, 128>}]} {
    %c0 = arith.constant 0 : index
    %c0_0 = arith.constant 0 : index
    %0 = vector.load %arg1[%c0, %c0_0] : memref<256x36xf32, #tpu.memory_space<vmem>>, vector<256x36xf32>
    %c0_1 = arith.constant 0 : index
    %c0_2 = arith.constant 0 : index
    %1 = vector.load %arg2[%c0_1, %c0_2] : memref<36x128xf32, #tpu.memory_space<vmem>>, vector<36x128xf32>
    %cst = arith.constant dense<0.000000e+00> : vector<256x128xf32>
    %2 = tpu.matmul %0, %1, %cst {dimension_numbers = #tpu.dot_dimension_numbers<[1], [0], [0], [1], [0, 0, 1, 1], [], []>} : vector<256x36xf32>, vector<36x128xf32>, vector<256x128xf32> -> vector<256x128xf32>
    %c0_3 = arith.constant 0 : index
    %c0_4 = arith.constant 0 : index
    %3 = vector.load %arg3[%c0_3, %c0_4] : memref<1x128xf32, #tpu.memory_space<vmem>>, vector<1x128xf32>
    %4 = vector.broadcast %3 : vector<1x128xf32> to vector<256x128xf32>
    %5 = arith.addf %2, %4 : vector<256x128xf32>
    %cst_5 = arith.constant 0.000000e+00 : f32
    %6 = vector.broadcast %cst_5 : f32 to vector<256x128xf32>
    %7 = arith.maximumf %5, %6 : vector<256x128xf32>
    %c0_6 = arith.constant 0 : index
    %c0_7 = arith.constant 0 : index
    %8 = vector.load %arg4[%c0_6, %c0_7] : memref<256x128xf32, #tpu.memory_space<vmem>>, vector<256x128xf32>
    tpu.vector_store %arg4[%c0_6, %c0_7], %7 {strides = array<i32>} : memref<256x128xf32, #tpu.memory_space<vmem>>, vector<256x128xf32>,
    return
  }
  func.func @transform_0(%arg0: i32) -> (i32, i32) {
    %c0_i32 = arith.constant 0 : i32
    %c0_i32_0 = arith.constant 0 : i32
    return %arg0, %c0_i32 : i32, i32
  }
  func.func @transform_1(%arg0: i32) -> (i32, i32) {
    %c0_i32 = arith.constant 0 : i32
    %c0_i32_0 = arith.constant 0 : i32
    %c0_i32_1 = arith.constant 0 : i32
    return %c0_i32, %c0_i32_0 : i32, i32
  }
  func.func @transform_2(%arg0: i32) -> (i32, i32) {
    %c0_i32 = arith.constant 0 : i32
    %c0_i32_0 = arith.constant 0 : i32
    %c0_i32_1 = arith.constant 0 : i32
    return %c0_i32, %c0_i32_0 : i32, i32
  }
  func.func @transform_3(%arg0: i32) -> (i32, i32) {
    %c0_i32 = arith.constant 0 : i32
    %c0_i32_0 = arith.constant 0 : i32
    return %arg0, %c0_i32 : i32, i32
  }
}

module attributes {stable_mosaic.version = 11 : i64} {
  func.func @_gemm_bias_act_kernel(%arg0: i32, %arg1: memref<256x72xf32, #tpu.memory_space<vmem>>, %arg2: memref<72x128xf32, #tpu.memory_space<vmem>>, %arg3: memref<1x128xf32, #tpu.memory_space<vmem>>, %arg4: memref<256x128xf32, #tpu.memory_space<vmem>>) attributes {dimension_semantics = [#tpu.dimension_semantics<parallel>], iteration_bounds = array<i64: 2>, scalar_prefetch = 0 : i64, scratch_operands = 0 : i64, tpu.core_type = #tpu.core_type<tc>, window_params = [{transform_indices = @transform_0, window_bounds = array<i64: 256, 72>}, {pipeline_mode = #tpu.pipeline_mode<synchronous>, transform_indices = @transform_1, window_bounds = array<i64: 72, 128>}, {pipeline_mode = #tpu.pipeline_mode<synchronous>, transform_indices = @transform_2, window_bounds = array<i64: 1, 128>}, {transform_indices = @transform_3, window_bounds = array<i64: 256, 128>}]} {
    %c0 = arith.constant 0 : index
    %c0_0 = arith.constant 0 : index
    %0 = vector.load %arg1[%c0, %c0_0] : memref<256x72xf32, #tpu.memory_space<vmem>>, vector<256x72xf32>
    %c0_1 = arith.constant 0 : index
    %c0_2 = arith.constant 0 : index
    %1 = vector.load %arg2[%c0_1, %c0_2] : memref<72x128xf32, #tpu.memory_space<vmem>>, vector<72x128xf32>
    %cst = arith.constant dense<0.000000e+00> : vector<256x128xf32>
    %2 = tpu.matmul %0, %1, %cst {dimension_numbers = #tpu.dot_dimension_numbers<[1], [0], [0], [1], [0, 0, 1, 1], [], []>} : vector<256x72xf32>, vector<72x128xf32>, vector<256x128xf32> -> vector<256x128xf32>
    %c0_3 = arith.constant 0 : index
    %c0_4 = arith.constant 0 : index
    %3 = vector.load %arg3[%c0_3, %c0_4] : memref<1x128xf32, #tpu.memory_space<vmem>>, vector<1x128xf32>
    %4 = vector.broadcast %3 : vector<1x128xf32> to vector<256x128xf32>
    %5 = arith.addf %2, %4 : vector<256x128xf32>
    %cst_5 = arith.constant 0.000000e+00 : f32
    %6 = vector.broadcast %cst_5 : f32 to vector<256x128xf32>
    %7 = arith.maximumf %5, %6 : vector<256x128xf32>
    %c0_6 = arith.constant 0 : index
    %c0_7 = arith.constant 0 : index
    %8 = vector.load %arg4[%c0_6, %c0_7] : memref<256x128xf32, #tpu.memory_space<vmem>>, vector<256x128xf32>
    tpu.vector_store %arg4[%c0_6, %c0_7], %7 {strides = array<i32>} : memref<256x128xf32, #tpu.memory_space<vmem>>, vector<256x128xf32>,
    return
  }
  func.func @transform_0(%arg0: i32) -> (i32, i32) {
    %c0_i32 = arith.constant 0 : i32
    %c0_i32_0 = arith.constant 0 : i32
    return %arg0, %c0_i32 : i32, i32
  }
  func.func @transform_1(%arg0: i32) -> (i32, i32) {
    %c0_i32 = arith.constant 0 : i32
    %c0_i32_0 = arith.constant 0 : i32
    %c0_i32_1 = arith.constant 0 : i32
    return %c0_i32, %c0_i32_0 : i32, i32
  }
  func.func @transform_2(%arg0: i32) -> (i32, i32) {
    %c0_i32 = arith.constant 0 : i32
    %c0_i32_0 = arith.constant 0 : i32
    %c0_i32_1 = arith.constant 0 : i32
    return %c0_i32, %c0_i32_0 : i32, i32
  }
  func.func @transform_3(%arg0: i32) -> (i32, i32) {
    %c0_i32 = arith.constant 0 : i32
    %c0_i32_0 = arith.constant 0 : i32
    return %arg0, %c0_i32 : i32, i32
  }
}

</mosaic_0001>

<bundles_post_ra>
// kernel: conv_block_forward.2
= control target key start
LH: loop header
LB: loop body
LE: loop exit
PB: predicated region body
PF: predicated region fallthrough
CT: control target
= control target key end

     0   :  { %s854_s12 = smov 0   ;;  %s1034_s0 = inlined_call_operand.vmem [shape: f32[512,36], index: 0, kind: input, shape index: {}]   ;;  %s1035_s1 = inlined_call_operand.vmem [shape: f32[36,128], index: 1, kind: input, shape index: {}]   ;;  %s1036_s2 = inlined_call_operand.vmem [shape: f32[1,128], index: 2, kind: input, shape index: {}]   ;;  %s1037_s3 = inlined_call_operand.vmem [shape: f32[512,128], index: 3, kind: output, shape index: {}]  }
   0x1 LB: > { %s664_s13 = sadd.s32 4294967295, %s832_s12   ;;  %p668_p0 = scmp.ge.s32.totalorder %s832_s12, 1  ;;  %s832_s12 = sphi %s854_s12, %s13_s12  }
   0x2   : > { %p138_p1 = scmp.lt.s32.totalorder %s832_s12, 3 }
   0x4   : > { %p139_p2 = pnand %p668_p0, %p138_p1 }
   0x5   : > { %v206_v0 = vld [vmem:[%s1035_s1] sm:$0xff] (!%p139_p2)  ;;  %v207_v1 = vld [vmem:[%s1035_s1 + $0x8] sm:$0xff] (!%p139_p2)  ;;  %v208_v2 = vld [vmem:[%s1035_s1 + $0x10] sm:$0xff] (!%p139_p2)  ;;  %s669_s20 = sshll.u32 (!%p139_p2), %s664_s13, 5  ;;  %vm315_vm0 = vcmask (!%p139_p2), 1043456   ;;  %vm218_vm1 = vcmask (!%p139_p2), 293888  }
   0x6   : > { %142 = sbr.rel (%p139_p2) target bundleno = 265 (0x109), region = 32  ;;  %v804_v3 = vpack.c.bf16 (!%p139_p2), %v207_v1, %v206_v0  ;;  %v209_v4 = vld [vmem:[%s1035_s1 + $0x18] sm:$0xff] (!%p139_p2)  ;;  %p163_p3 = scmp.lt.s32.totalorder (!%p139_p2), %s669_s20, 63  ;;  %v210_v6 = vld [vmem:[%s1035_s1 + $0x20] sm:$0xf] (!%p139_p2) }
   0x7   : > { %v808_v5 = vpack.c.bf16 (!%p139_p2), %v209_v4, %v208_v2  ;;  %v958_v39 = vld [vmem:[%s1036_s2] ss:$0 sm:$0xff] (!%p139_p2) }
   0x8   : > { %805 = vmatprep.subr.bf16.mxu0 (!%p139_p2), %v804_v3  ;;  %812 = vmatprep.subr.bf16.mxu1 (!%p139_p2), %v804_v3 }
   0x9   : > { %807 = vmatpush3.bf16.msra.mxu0 (!%p139_p2), %v804_v3  ;;  %815 = vmatpush3.bf16.msra.mxu1 (!%p139_p2), %v804_v3 }
   0xa   : > { %809 = vmatprep.subr.bf16.mxu0 (!%p139_p2), %v808_v5  ;;  %813 = vmatprep.subr.bf16.mxu1 (!%p139_p2), %v808_v5 }
   0xd   : > { %s1039_s20 = smov (!%p163_p3, %s669_s20), 63  ;;  %811 = vmatpush3.bf16.msra.mxu0 %v808_v5  ;;  %816 = vmatpush3.bf16.msra.mxu1 %v808_v5 }
   0xe   : > { %s670_s23 = sshll.u32 %s1039_s20, 3  ;;  %754 = vmatprep.subr.msk.mxu0 %vm315_vm0, %v210_v6  ;;  %814 = vmatprep.subr.msk.mxu1 %vm315_vm0, %v210_v6 }
   0xf   : > { %s885_s28 = scalar_lea.vmem %s1034_s0, %s670_s23  ;;  %s967_s6 = scalar_lea.vmem %s1037_s3, %s670_s23 }
  0x10   : > { %v174_v7 = vld [vmem:[%s885_s28] sm:$0xff]  ;;  %v175_v9 = vld [vmem:[%s885_s28 + $0x8] sm:$0xff]  ;;  %v176_v11 = vld [vmem:[%s885_s28 + $0x10] sm:$0xff] }
  0x11   : > { %v190_v8 = vld [vmem:[%s885_s28 + $0x80] sm:$0xff]  ;;  %756 = vmatprep.mubr.msk.f32.mxu0 %vm218_vm1, %v174_v7  ;;  %v191_v10 = vld [vmem:[%s885_s28 + $0x88] sm:$0xff]  ;;  %v192_v12 = vld [vmem:[%s885_s28 + $0x90] sm:$0xff]  ;;  %755 = vmatpush3.msk.msra.mxu0 %vm315_vm0, %v210_v6 }
  0x12   : > { %780 = vmatprep.mubr.msk.f32.mxu1 %vm218_vm1, %v190_v8  ;;  %817 = vmatpush3.msk.msra.mxu1 %vm315_vm0, %v210_v6  ;;  %v177_v13 = vld [vmem:[%s885_s28 + $0x18] sm:$0xff]  ;;  %v178_v15 = vld [vmem:[%s885_s28 + $0x20] sm:$0xff]  ;;  %v179_v17 = vld [vmem:[%s885_s28 + $0x28] sm:$0xff] }
  0x13   : > { %757 = vmatmul.mubr.msk.f32.vlgmr.msra.gmra.mrb[0].mxu0 %vm218_vm1, %v175_v9  ;;  %781 = vmatmul.mubr.msk.f32.vlgmr.msra.gmra.mrb[0].mxu1 %vm218_vm1, %v191_v10  ;;  %v193_v14 = vld [vmem:[%s885_s28 + $0x98] sm:$0xff]  ;;  %v194_v16 = vld [vmem:[%s885_s28 + $0xa0] sm:$0xff]  ;;  %v195_v18 = vld [vmem:[%s885_s28 + $0xa8] sm:$0xff] }
  0x14   : > { %759 = vmatprep.mubr.msk.f32.mxu0 %vm218_vm1, %v176_v11  ;;  %783 = vmatprep.mubr.msk.f32.mxu1 %vm218_vm1, %v192_v12  ;;  %v180_v19 = vld [vmem:[%s885_s28 + $0x30] sm:$0xff]  ;;  %v181_v21 = vld [vmem:[%s885_s28 + $0x38] sm:$0xff]  ;;  %v182_v23 = vld [vmem:[%s885_s28 + $0x40] sm:$0xff] }
  0x15   : > { %v196_v20 = vld [vmem:[%s885_s28 + $0xb0] sm:$0xff]  ;;  %v197_v22 = vld [vmem:[%s885_s28 + $0xb8] sm:$0xff]  ;;  %v198_v24 = vld [vmem:[%s885_s28 + $0xc0] sm:$0xff] }
  0x16   : > { %v183_v25 = vld [vmem:[%s885_s28 + $0x48] sm:$0xff]  ;;  %v184_v27 = vld [vmem:[%s885_s28 + $0x50] sm:$0xff]  ;;  %v185_v29 = vld [vmem:[%s885_s28 + $0x58] sm:$0xff] }
  0x17   : > { %760 = vmatmul.mubr.msk.f32.gmra.mrb[2].mxu0 %vm218_vm1, %v177_v13  ;;  %784 = vmatmul.mubr.msk.f32.gmra.mrb[2].mxu1 %vm218_vm1, %v193_v14  ;;  %v199_v26 = vld [vmem:[%s885_s28 + $0xc8] sm:$0xff]  ;;  %v200_v28 = vld [vmem:[%s885_s28 + $0xd0] sm:$0xff]  ;;  %v201_v30 = vld [vmem:[%s885_s28 + $0xd8] sm:$0xff] }
  0x18   : > { %762 = vmatprep.mubr.msk.f32.mxu0 %vm218_vm1, %v178_v15  ;;  %786 = vmatprep.mubr.msk.f32.mxu1 %vm218_vm1, %v194_v16  ;;  %v186_v31 = vld [vmem:[%s885_s28 + $0x60] sm:$0xff]  ;;  %v187_v33 = vld [vmem:[%s885_s28 + $0x68] sm:$0xff]  ;;  %v188_v35 = vld [vmem:[%s885_s28 + $0x70] sm:$0xff] }
  0x19   : > { %v202_v32 = vld [vmem:[%s885_s28 + $0xe0] sm:$0xff]  ;;  %v203_v34 = vld [vmem:[%s885_s28 + $0xe8] sm:$0xff]  ;;  %v204_v36 = vld [vmem:[%s885_s28 + $0xf0] sm:$0xff] }
  0x1a   : > { %v189_v37 = vld [vmem:[%s885_s28 + $0x78] sm:$0xff] }
  0x1b   : > { %763 = vmatmul.mubr.msk.f32.gmra.mrb[4].mxu0 %vm218_vm1, %v179_v17  ;;  %787 = vmatmul.mubr.msk.f32.gmra.mrb[4].mxu1 %vm218_vm1, %v195_v18  ;;  %v205_v38 = vld [vmem:[%s885_s28 + $0xf8] sm:$0xff] }
  0x1c   : > { %765 = vmatprep.mubr.msk.f32.mxu0 %vm218_vm1, %v180_v19  ;;  %789 = vmatprep.mubr.msk.f32.mxu1 %vm218_vm1, %v196_v20 }
  0x1f   : > { %766 = vmatmul.mubr.msk.f32.gmra.mrb[6].mxu0 %vm218_vm1, %v181_v21  ;;  %790 = vmatmul.mubr.msk.f32.gmra.mrb[6].mxu1 %vm218_vm1, %v197_v22 }
  0x20   : > { %768 = vmatprep.mubr.msk.f32.mxu0 %vm218_vm1, %v182_v23  ;;  %792 = vmatprep.mubr.msk.f32.mxu1 %vm218_vm1, %v198_v24 }
  0x23   : > { %769 = vmatmul.mubr.msk.f32.gmra.mrb[8].mxu0 %vm218_vm1, %v183_v25  ;;  %793 = vmatmul.mubr.msk.f32.gmra.mrb[8].mxu1 %vm218_vm1, %v199_v26 }
  0x24   : > { %771 = vmatprep.mubr.msk.f32.mxu0 %vm218_vm1, %v184_v27  ;;  %795 = vmatprep.mubr.msk.f32.mxu1 %vm218_vm1, %v200_v28 }
  0x27   : > { %772 = vmatmul.mubr.msk.f32.gmra.mrb[10].mxu0 %vm218_vm1, %v185_v29  ;;  %796 = vmatmul.mubr.msk.f32.gmra.mrb[10].mxu1 %vm218_vm1, %v201_v30 }
  0x28   : > { %774 = vmatprep.mubr.msk.f32.mxu0 %vm218_vm1, %v186_v31  ;;  %798 = vmatprep.mubr.msk.f32.mxu1 %vm218_vm1, %v202_v32 }
  0x2b   : > { %775 = vmatmul.mubr.msk.f32.gmra.mrb[12].mxu0 %vm218_vm1, %v187_v33  ;;  %799 = vmatmul.mubr.msk.f32.gmra.mrb[12].mxu1 %vm218_vm1, %v203_v34 }
  0x2c   : > { %777 = vmatprep.mubr.msk.f32.mxu0 %vm218_vm1, %v188_v35  ;;  %801 = vmatprep.mubr.msk.f32.mxu1 %vm218_vm1, %v204_v36 }
  0x2f   : > { %778 = vmatmul.mubr.msk.f32.gmra.mrb[14].mxu0 %vm218_vm1, %v189_v37  ;;  %802 = vmatmul.mubr.msk.f32.gmra.mrb[14].mxu1 %vm218_vm1, %v205_v38 }
  0xe6   : > { %v758_v40 = vpop.f32.mrb[0].mxu0  ;;  %v782_v41 = vpop.f32.mrb[0].mxu1 }
  0xe7   : > { %v391_v42 = vadd.f32 %v758_v40, %v958_v39  ;;  %v471_v43 = vadd.f32 %v782_v41, %v958_v39  ;;  %v385_v44 = vpop.f32.mrb[1].mxu0  ;;  %v465_v45 = vpop.f32.mrb[1].mxu1 }
  0xe8   : > { %v386_v46 = vadd.f32 %v958_v39, %v385_v44  ;;  %v466_v47 = vadd.f32 %v958_v39, %v465_v45 }
  0xe9   : > { %v545_v48 = vmax.f32 %v391_v42, 0.0  ;;  %v561_v49 = vmax.f32 %v471_v43, 0.0 }
  0xea   : > { %v544_v50 = vmax.f32 %v386_v46, 0.0  ;;  %v560_v51 = vmax.f32 %v466_v47, 0.0  ;;  %v761_v52 = vpop.f32.mrb[2].mxu0  ;;  %v785_v53 = vpop.f32.mrb[2].mxu1 }
  0xeb   : > { %577 = vst [vmem:[%s967_s6 + $0x8] sm:$0xff] %v545_v48  ;;  %593 = vst [vmem:[%s967_s6 + $0x88] sm:$0xff] %v561_v49  ;;  %v401_v54 = vadd.f32 %v761_v52, %v958_v39  ;;  %v481_v55 = vadd.f32 %v785_v53, %v958_v39  ;;  %v395_v56 = vpop.f32.mrb[3].mxu0  ;;  %v475_v57 = vpop.f32.mrb[3].mxu1 }
  0xec   : > { %576 = vst [vmem:[%s967_s6] sm:$0xff] %v544_v50  ;;  %592 = vst [vmem:[%s967_s6 + $0x80] sm:$0xff] %v560_v51  ;;  %v396_v58 = vadd.f32 %v958_v39, %v395_v56  ;;  %v476_v59 = vadd.f32 %v958_v39, %v475_v57 }
  0xed   : > { %v547_v60 = vmax.f32 %v401_v54, 0.0  ;;  %v563_v61 = vmax.f32 %v481_v55, 0.0 }
  0xee   : > { %v546_v62 = vmax.f32 %v396_v58, 0.0  ;;  %v562_v63 = vmax.f32 %v476_v59, 0.0  ;;  %v764_v0 = vpop.f32.mrb[4].mxu0  ;;  %v788_v1 = vpop.f32.mrb[4].mxu1 }
  0xef   : > { %579 = vst [vmem:[%s967_s6 + $0x18] sm:$0xff] %v547_v60  ;;  %595 = vst [vmem:[%s967_s6 + $0x98] sm:$0xff] %v563_v61  ;;  %v411_v2 = vadd.f32 %v764_v0, %v958_v39  ;;  %v491_v3 = vadd.f32 %v788_v1, %v958_v39  ;;  %v405_v4 = vpop.f32.mrb[5].mxu0  ;;  %v485_v5 = vpop.f32.mrb[5].mxu1 }
  0xf0   : > { %578 = vst [vmem:[%s967_s6 + $0x10] sm:$0xff] %v546_v62  ;;  %594 = vst [vmem:[%s967_s6 + $0x90] sm:$0xff] %v562_v63  ;;  %v406_v6 = vadd.f32 %v958_v39, %v405_v4  ;;  %v486_v7 = vadd.f32 %v958_v39, %v485_v5 }
  0xf1   : > { %v549_v8 = vmax.f32 %v411_v2, 0.0  ;;  %v565_v9 = vmax.f32 %v491_v3, 0.0 }
  0xf2   : > { %v548_v10 = vmax.f32 %v406_v6, 0.0  ;;  %v564_v11 = vmax.f32 %v486_v7, 0.0  ;;  %v767_v12 = vpop.f32.mrb[6].mxu0  ;;  %v791_v13 = vpop.f32.mrb[6].mxu1 }
  0xf3   : > { %581 = vst [vmem:[%s967_s6 + $0x28] sm:$0xff] %v549_v8  ;;  %597 = vst [vmem:[%s967_s6 + $0xa8] sm:$0xff] %v565_v9  ;;  %v421_v14 = vadd.f32 %v767_v12, %v958_v39  ;;  %v501_v15 = vadd.f32 %v791_v13, %v958_v39  ;;  %v415_v16 = vpop.f32.mrb[7].mxu0  ;;  %v495_v17 = vpop.f32.mrb[7].mxu1 }
  0xf4   : > { %580 = vst [vmem:[%s967_s6 + $0x20] sm:$0xff] %v548_v10  ;;  %596 = vst [vmem:[%s967_s6 + $0xa0] sm:$0xff] %v564_v11  ;;  %v416_v18 = vadd.f32 %v958_v39, %v415_v16  ;;  %v496_v19 = vadd.f32 %v958_v39, %v495_v17 }
  0xf5   : > { %v551_v20 = vmax.f32 %v421_v14, 0.0  ;;  %v567_v21 = vmax.f32 %v501_v15, 0.0 }
  0xf6   : > { %v550_v22 = vmax.f32 %v416_v18, 0.0  ;;  %v566_v23 = vmax.f32 %v496_v19, 0.0  ;;  %v770_v24 = vpop.f32.mrb[8].mxu0  ;;  %v794_v25 = vpop.f32.mrb[8].mxu1 }
  0xf7   : > { %583 = vst [vmem:[%s967_s6 + $0x38] sm:$0xff] %v551_v20  ;;  %599 = vst [vmem:[%s967_s6 + $0xb8] sm:$0xff] %v567_v21  ;;  %v431_v26 = vadd.f32 %v770_v24, %v958_v39  ;;  %v511_v27 = vadd.f32 %v794_v25, %v958_v39  ;;  %v425_v28 = vpop.f32.mrb[9].mxu0  ;;  %v505_v29 = vpop.f32.mrb[9].mxu1 }
  0xf8   : > { %582 = vst [vmem:[%s967_s6 + $0x30] sm:$0xff] %v550_v22  ;;  %598 = vst [vmem:[%s967_s6 + $0xb0] sm:$0xff] %v566_v23  ;;  %v426_v30 = vadd.f32 %v958_v39, %v425_v28  ;;  %v506_v31 = vadd.f32 %v958_v39, %v505_v29 }
  0xf9   : > { %v553_v32 = vmax.f32 %v431_v26, 0.0  ;;  %v569_v33 = vmax.f32 %v511_v27, 0.0 }
  0xfa   : > { %v552_v34 = vmax.f32 %v426_v30, 0.0  ;;  %v568_v35 = vmax.f32 %v506_v31, 0.0  ;;  %v773_v36 = vpop.f32.mrb[10].mxu0  ;;  %v797_v37 = vpop.f32.mrb[10].mxu1 }
  0xfb   : > { %585 = vst [vmem:[%s967_s6 + $0x48] sm:$0xff] %v553_v32  ;;  %601 = vst [vmem:[%s967_s6 + $0xc8] sm:$0xff] %v569_v33  ;;  %v441_v38 = vadd.f32 %v773_v36, %v958_v39  ;;  %v521_v40 = vadd.f32 %v797_v37, %v958_v39  ;;  %v435_v41 = vpop.f32.mrb[11].mxu0  ;;  %v515_v42 = vpop.f32.mrb[11].mxu1 }
  0xfc   : > { %584 = vst [vmem:[%s967_s6 + $0x40] sm:$0xff] %v552_v34  ;;  %600 = vst [vmem:[%s967_s6 + $0xc0] sm:$0xff] %v568_v35  ;;  %v436_v43 = vadd.f32 %v958_v39, %v435_v41  ;;  %v516_v44 = vadd.f32 %v958_v39, %v515_v42 }
  0xfd   : > { %v555_v45 = vmax.f32 %v441_v38, 0.0  ;;  %v571_v46 = vmax.f32 %v521_v40, 0.0 }
  0xfe   : > { %v554_v47 = vmax.f32 %v436_v43, 0.0  ;;  %v570_v48 = vmax.f32 %v516_v44, 0.0  ;;  %v776_v49 = vpop.f32.mrb[12].mxu0  ;;  %v800_v50 = vpop.f32.mrb[12].mxu1 }
  0xff   : > { %587 = vst [vmem:[%s967_s6 + $0x58] sm:$0xff] %v555_v45  ;;  %603 = vst [vmem:[%s967_s6 + $0xd8] sm:$0xff] %v571_v46  ;;  %v451_v51 = vadd.f32 %v776_v49, %v958_v39  ;;  %v531_v52 = vadd.f32 %v800_v50, %v958_v39  ;;  %v445_v53 = vpop.f32.mrb[13].mxu0  ;;  %v525_v54 = vpop.f32.mrb[13].mxu1 }
 0x100   : > { %586 = vst [vmem:[%s967_s6 + $0x50] sm:$0xff] %v554_v47  ;;  %602 = vst [vmem:[%s967_s6 + $0xd0] sm:$0xff] %v570_v48  ;;  %v446_v55 = vadd.f32 %v958_v39, %v445_v53  ;;  %v526_v56 = vadd.f32 %v958_v39, %v525_v54 }
 0x101   : > { %v557_v57 = vmax.f32 %v451_v51, 0.0  ;;  %v573_v58 = vmax.f32 %v531_v52, 0.0 }
 0x102   : > { %v556_v59 = vmax.f32 %v446_v55, 0.0  ;;  %v572_v60 = vmax.f32 %v526_v56, 0.0  ;;  %v779_v61 = vpop.f32.mrb[14].mxu0  ;;  %v803_v62 = vpop.f32.mrb[14].mxu1 }
 0x103   : > { %589 = vst [vmem:[%s967_s6 + $0x68] sm:$0xff] %v557_v57  ;;  %605 = vst [vmem:[%s967_s6 + $0xe8] sm:$0xff] %v573_v58  ;;  %v461_v63 = vadd.f32 %v779_v61, %v958_v39  ;;  %v541_v0 = vadd.f32 %v803_v62, %v958_v39  ;;  %v455_v1 = vpop.f32.mrb[15].mxu0  ;;  %v535_v2 = vpop.f32.mrb[15].mxu1 }
 0x104   : > { %588 = vst [vmem:[%s967_s6 + $0x60] sm:$0xff] %v556_v59  ;;  %604 = vst [vmem:[%s967_s6 + $0xe0] sm:$0xff] %v572_v60  ;;  %v456_v3 = vadd.f32 %v958_v39, %v455_v1  ;;  %v536_v4 = vadd.f32 %v958_v39, %v535_v2 }
 0x105   : > { %v559_v5 = vmax.f32 %v461_v63, 0.0  ;;  %v575_v6 = vmax.f32 %v541_v0, 0.0 }
 0x106   : > { %v558_v7 = vmax.f32 %v456_v3, 0.0  ;;  %v574_v8 = vmax.f32 %v536_v4, 0.0 }
 0x107   : > { %591 = vst [vmem:[%s967_s6 + $0x78] sm:$0xff] %v559_v5  ;;  %607 = vst [vmem:[%s967_s6 + $0xf8] sm:$0xff] %v575_v6 }
 0x108   : > { %590 = vst [vmem:[%s967_s6 + $0x70] sm:$0xff] %v558_v7  ;;  %606 = vst [vmem:[%s967_s6 + $0xf0] sm:$0xff] %v574_v8 }
 0x109 PF: > { %s13_s12 = sadd.s32 1, %s832_s12  }
 0x10a   : > { %p10_p4 = scmp.ge.s32.totalorder %s13_s12, 4  }
 0x10c   :  { %12 = sbr.rel (!%p10_p4) target bundleno = 1 (0x1), region = 62 }

// kernel: conv_block_forward.3
= control target key start
LH: loop header
LB: loop body
LE: loop exit
PB: predicated region body
PF: predicated region fallthrough
CT: control target
= control target key end

     0   :  { %s877_s12 = smov 0   ;;  %s1065_s0 = inlined_call_operand.vmem [shape: f32[512,72], index: 0, kind: input, shape index: {}]   ;;  %s1066_s1 = inlined_call_operand.vmem [shape: f32[72,128], index: 1, kind: input, shape index: {}]   ;;  %s1067_s2 = inlined_call_operand.vmem [shape: f32[1,128], index: 2, kind: input, shape index: {}]   ;;  %s1068_s3 = inlined_call_operand.vmem [shape: f32[512,128], index: 3, kind: output, shape index: {}]  }
   0x1 LB: > { %s664_s13 = sadd.s32 4294967295, %s855_s12   ;;  %p668_p0 = scmp.ge.s32.totalorder %s855_s12, 1  ;;  %s855_s12 = sphi %s877_s12, %s13_s12  }
   0x2   : > { %p138_p1 = scmp.lt.s32.totalorder %s855_s12, 3 }
   0x4   : > { %p139_p2 = pnand %p668_p0, %p138_p1 }
   0x5   : > { %v206_v0 = vld [vmem:[%s1066_s1] sm:$0xff] (!%p139_p2)  ;;  %v207_v1 = vld [vmem:[%s1066_s1 + $0x8] sm:$0xff] (!%p139_p2)  ;;  %v208_v2 = vld [vmem:[%s1066_s1 + $0x10] sm:$0xff] (!%p139_p2)  ;;  %s669_s20 = sshll.u32 (!%p139_p2), %s664_s13, 5  ;;  %vm222_vm0 = vcmask (!%p139_p2), 588800  }
   0x6   : > { %142 = sbr.rel (%p139_p2) target bundleno = 273 (0x111), region = 32  ;;  %v815_v3 = vpack.c.bf16 (!%p139_p2), %v207_v1, %v206_v0  ;;  %v209_v4 = vld [vmem:[%s1066_s1 + $0x18] sm:$0xff] (!%p139_p2)  ;;  %p163_p3 = scmp.lt.s32.totalorder (!%p139_p2), %s669_s20, 63  ;;  %v210_v6 = vld [vmem:[%s1066_s1 + $0x20] sm:$0xff] (!%p139_p2)  ;;  %v211_v7 = vld [vmem:[%s1066_s1 + $0x28] sm:$0xff] (!%p139_p2) }
   0x7   : > { %v819_v5 = vpack.c.bf16 (!%p139_p2), %v209_v4, %v208_v2  ;;  %v823_v8 = vpack.c.bf16 (!%p139_p2), %v211_v7, %v210_v6  ;;  %v212_v9 = vld [vmem:[%s1066_s1 + $0x30] sm:$0xff] (!%p139_p2)  ;;  %v213_v10 = vld [vmem:[%s1066_s1 + $0x38] sm:$0xff] (!%p139_p2)  ;;  %v214_v14 = vld [vmem:[%s1066_s1 + $0x40] sm:$0xff] (!%p139_p2) }
   0x8   : > { %816 = vmatprep.subr.bf16.mxu0 (!%p139_p2), %v815_v3  ;;  %831 = vmatprep.subr.bf16.mxu1 (!%p139_p2), %v815_v3  ;;  %v827_v13 = vpack.c.bf16 (!%p139_p2), %v213_v10, %v212_v9  ;;  %v989_v45 = vld [vmem:[%s1067_s2] ss:$0 sm:$0xff] (!%p139_p2) }
   0x9   : > { %818 = vmatpush3.bf16.msra.mxu0 (!%p139_p2), %v815_v3  ;;  %836 = vmatpush3.bf16.msra.mxu1 (!%p139_p2), %v815_v3 }
   0xa   : > { %820 = vmatprep.subr.bf16.mxu0 (!%p139_p2), %v819_v5  ;;  %832 = vmatprep.subr.bf16.mxu1 (!%p139_p2), %v819_v5 }
   0xd   : > { %s1070_s20 = smov (!%p163_p3, %s669_s20), 63  ;;  %822 = vmatpush3.bf16.msra.mxu0 %v819_v5  ;;  %837 = vmatpush3.bf16.msra.mxu1 %v819_v5 }
   0xe   : > { %s670_s27 = sshll.u32 %s1070_s20, 3  ;;  %824 = vmatprep.subr.bf16.mxu0 %v823_v8  ;;  %833 = vmatprep.subr.bf16.mxu1 %v823_v8 }
   0xf   : > { %s917_s7 = scalar_lea.vmem %s1065_s0, %s670_s27  ;;  %s998_s15 = scalar_lea.vmem %s1068_s3, %s670_s27 }
  0x10   : > { %v174_v11 = vld [vmem:[%s917_s7] sm:$0xff]  ;;  %v175_v15 = vld [vmem:[%s917_s7 + $0x8] sm:$0xff]  ;;  %v176_v17 = vld [vmem:[%s917_s7 + $0x10] sm:$0xff] }
  0x11   : > { %v190_v12 = vld [vmem:[%s917_s7 + $0x80] sm:$0xff]  ;;  %767 = vmatprep.mubr.msk.f32.mxu0 %vm222_vm0, %v174_v11  ;;  %826 = vmatpush3.bf16.msra.mxu0 %v823_v8  ;;  %v191_v16 = vld [vmem:[%s917_s7 + $0x88] sm:$0xff]  ;;  %v192_v18 = vld [vmem:[%s917_s7 + $0x90] sm:$0xff] }
  0x12   : > { %791 = vmatprep.mubr.msk.f32.mxu1 %vm222_vm0, %v190_v12  ;;  %838 = vmatpush3.bf16.msra.mxu1 %v823_v8  ;;  %v177_v19 = vld [vmem:[%s917_s7 + $0x18] sm:$0xff]  ;;  %v178_v21 = vld [vmem:[%s917_s7 + $0x20] sm:$0xff]  ;;  %v179_v23 = vld [vmem:[%s917_s7 + $0x28] sm:$0xff] }
  0x13   : > { %828 = vmatprep.subr.bf16.mxu0 %v827_v13  ;;  %834 = vmatprep.subr.bf16.mxu1 %v827_v13  ;;  %v193_v20 = vld [vmem:[%s917_s7 + $0x98] sm:$0xff]  ;;  %v194_v22 = vld [vmem:[%s917_s7 + $0xa0] sm:$0xff]  ;;  %v195_v24 = vld [vmem:[%s917_s7 + $0xa8] sm:$0xff] }
  0x14   : > { %v180_v25 = vld [vmem:[%s917_s7 + $0x30] sm:$0xff]  ;;  %v181_v27 = vld [vmem:[%s917_s7 + $0x38] sm:$0xff]  ;;  %v182_v29 = vld [vmem:[%s917_s7 + $0x40] sm:$0xff] }
  0x15   : > { %830 = vmatpush3.bf16.msra.mxu0 %v827_v13  ;;  %v196_v26 = vld [vmem:[%s917_s7 + $0xb0] sm:$0xff]  ;;  %v197_v28 = vld [vmem:[%s917_s7 + $0xb8] sm:$0xff]  ;;  %v198_v30 = vld [vmem:[%s917_s7 + $0xc0] sm:$0xff] }
  0x16   : > { %839 = vmatpush3.bf16.msra.mxu1 %v827_v13  ;;  %765 = vmatprep.subr.mxu0 %v214_v14  ;;  %v183_v31 = vld [vmem:[%s917_s7 + $0x48] sm:$0xff]  ;;  %v184_v33 = vld [vmem:[%s917_s7 + $0x50] sm:$0xff]  ;;  %v185_v35 = vld [vmem:[%s917_s7 + $0x58] sm:$0xff] }
  0x17   : > { %835 = vmatprep.subr.mxu1 %v214_v14  ;;  %v199_v32 = vld [vmem:[%s917_s7 + $0xc8] sm:$0xff]  ;;  %v200_v34 = vld [vmem:[%s917_s7 + $0xd0] sm:$0xff]  ;;  %v201_v36 = vld [vmem:[%s917_s7 + $0xd8] sm:$0xff] }
  0x18   : > { %v186_v37 = vld [vmem:[%s917_s7 + $0x60] sm:$0xff]  ;;  %v187_v39 = vld [vmem:[%s917_s7 + $0x68] sm:$0xff]  ;;  %v188_v41 = vld [vmem:[%s917_s7 + $0x70] sm:$0xff] }
  0x19   : > { %766 = vmatpush3.msra.mxu0 %v214_v14  ;;  %v202_v38 = vld [vmem:[%s917_s7 + $0xe0] sm:$0xff]  ;;  %v203_v40 = vld [vmem:[%s917_s7 + $0xe8] sm:$0xff]  ;;  %v204_v42 = vld [vmem:[%s917_s7 + $0xf0] sm:$0xff] }
  0x1a   : > { %840 = vmatpush3.msra.mxu1 %v214_v14  ;;  %768 = vmatmul.mubr.msk.f32.vlgmr.msra.gmra.mrb[0].mxu0 %vm222_vm0, %v175_v15  ;;  %v189_v43 = vld [vmem:[%s917_s7 + $0x78] sm:$0xff] }
  0x1b   : > { %792 = vmatmul.mubr.msk.f32.vlgmr.msra.gmra.mrb[0].mxu1 %vm222_vm0, %v191_v16  ;;  %770 = vmatprep.mubr.msk.f32.mxu0 %vm222_vm0, %v176_v17  ;;  %v205_v44 = vld [vmem:[%s917_s7 + $0xf8] sm:$0xff] }
  0x1c   : > { %794 = vmatprep.mubr.msk.f32.mxu1 %vm222_vm0, %v192_v18 }
  0x1e   : > { %771 = vmatmul.mubr.msk.f32.gmra.mrb[2].mxu0 %vm222_vm0, %v177_v19 }
  0x1f   : > { %795 = vmatmul.mubr.msk.f32.gmra.mrb[2].mxu1 %vm222_vm0, %v193_v20  ;;  %773 = vmatprep.mubr.msk.f32.mxu0 %vm222_vm0, %v178_v21 }
  0x20   : > { %797 = vmatprep.mubr.msk.f32.mxu1 %vm222_vm0, %v194_v22 }
  0x22   : > { %774 = vmatmul.mubr.msk.f32.gmra.mrb[4].mxu0 %vm222_vm0, %v179_v23 }
  0x23   : > { %798 = vmatmul.mubr.msk.f32.gmra.mrb[4].mxu1 %vm222_vm0, %v195_v24  ;;  %776 = vmatprep.mubr.msk.f32.mxu0 %vm222_vm0, %v180_v25 }
  0x24   : > { %800 = vmatprep.mubr.msk.f32.mxu1 %vm222_vm0, %v196_v26 }
  0x26   : > { %777 = vmatmul.mubr.msk.f32.gmra.mrb[6].mxu0 %vm222_vm0, %v181_v27 }
  0x27   : > { %801 = vmatmul.mubr.msk.f32.gmra.mrb[6].mxu1 %vm222_vm0, %v197_v28  ;;  %779 = vmatprep.mubr.msk.f32.mxu0 %vm222_vm0, %v182_v29 }
  0x28   : > { %803 = vmatprep.mubr.msk.f32.mxu1 %vm222_vm0, %v198_v30 }
  0x2a   : > { %780 = vmatmul.mubr.msk.f32.gmra.mrb[8].mxu0 %vm222_vm0, %v183_v31 }
  0x2b   : > { %804 = vmatmul.mubr.msk.f32.gmra.mrb[8].mxu1 %vm222_vm0, %v199_v32  ;;  %782 = vmatprep.mubr.msk.f32.mxu0 %vm222_vm0, %v184_v33 }
  0x2c   : > { %806 = vmatprep.mubr.msk.f32.mxu1 %vm222_vm0, %v200_v34 }
  0x2e   : > { %783 = vmatmul.mubr.msk.f32.gmra.mrb[10].mxu0 %vm222_vm0, %v185_v35 }
  0x2f   : > { %807 = vmatmul.mubr.msk.f32.gmra.mrb[10].mxu1 %vm222_vm0, %v201_v36  ;;  %785 = vmatprep.mubr.msk.f32.mxu0 %vm222_vm0, %v186_v37 }
  0x30   : > { %809 = vmatprep.mubr.msk.f32.mxu1 %vm222_vm0, %v202_v38 }
  0x32   : > { %786 = vmatmul.mubr.msk.f32.gmra.mrb[12].mxu0 %vm222_vm0, %v187_v39 }
  0x33   : > { %810 = vmatmul.mubr.msk.f32.gmra.mrb[12].mxu1 %vm222_vm0, %v203_v40  ;;  %788 = vmatprep.mubr.msk.f32.mxu0 %vm222_vm0, %v188_v41 }
  0x34   : > { %812 = vmatprep.mubr.msk.f32.mxu1 %vm222_vm0, %v204_v42 }
  0x36   : > { %789 = vmatmul.mubr.msk.f32.gmra.mrb[14].mxu0 %vm222_vm0, %v189_v43 }
  0x37   : > { %813 = vmatmul.mubr.msk.f32.gmra.mrb[14].mxu1 %vm222_vm0, %v205_v44 }
  0xed   : > { %v769_v46 = vpop.f32.mrb[0].mxu0 }
  0xee   : > { %v793_v47 = vpop.f32.mrb[0].mxu1  ;;  %v391_v48 = vadd.f32 %v769_v46, %v989_v45  ;;  %v385_v50 = vpop.f32.mrb[1].mxu0 }
  0xef   : > { %v471_v49 = vadd.f32 %v793_v47, %v989_v45  ;;  %v465_v51 = vpop.f32.mrb[1].mxu1  ;;  %v386_v52 = vadd.f32 %v989_v45, %v385_v50 }
  0xf0   : > { %v466_v53 = vadd.f32 %v989_v45, %v465_v51  ;;  %v545_v54 = vmax.f32 %v391_v48, 0.0 }
  0xf1   : > { %v561_v55 = vmax.f32 %v471_v49, 0.0  ;;  %v544_v56 = vmax.f32 %v386_v52, 0.0  ;;  %v772_v58 = vpop.f32.mrb[2].mxu0 }
  0xf2   : > { %v560_v57 = vmax.f32 %v466_v53, 0.0  ;;  %v796_v59 = vpop.f32.mrb[2].mxu1  ;;  %577 = vst [vmem:[%s998_s15 + $0x8] sm:$0xff] %v545_v54  ;;  %v401_v60 = vadd.f32 %v772_v58, %v989_v45  ;;  %v395_v62 = vpop.f32.mrb[3].mxu0 }
  0xf3   : > { %593 = vst [vmem:[%s998_s15 + $0x88] sm:$0xff] %v561_v55  ;;  %v481_v61 = vadd.f32 %v796_v59, %v989_v45  ;;  %v475_v63 = vpop.f32.mrb[3].mxu1  ;;  %576 = vst [vmem:[%s998_s15] sm:$0xff] %v544_v56  ;;  %v396_v0 = vadd.f32 %v989_v45, %v395_v62 }
  0xf4   : > { %592 = vst [vmem:[%s998_s15 + $0x80] sm:$0xff] %v560_v57  ;;  %v476_v1 = vadd.f32 %v989_v45, %v475_v63  ;;  %v547_v2 = vmax.f32 %v401_v60, 0.0 }
  0xf5   : > { %v563_v3 = vmax.f32 %v481_v61, 0.0  ;;  %v546_v4 = vmax.f32 %v396_v0, 0.0  ;;  %v775_v6 = vpop.f32.mrb[4].mxu0 }
  0xf6   : > { %v562_v5 = vmax.f32 %v476_v1, 0.0  ;;  %v799_v7 = vpop.f32.mrb[4].mxu1  ;;  %579 = vst [vmem:[%s998_s15 + $0x18] sm:$0xff] %v547_v2  ;;  %v411_v8 = vadd.f32 %v775_v6, %v989_v45  ;;  %v405_v10 = vpop.f32.mrb[5].mxu0 }
  0xf7   : > { %595 = vst [vmem:[%s998_s15 + $0x98] sm:$0xff] %v563_v3  ;;  %v491_v9 = vadd.f32 %v799_v7, %v989_v45  ;;  %v485_v11 = vpop.f32.mrb[5].mxu1  ;;  %578 = vst [vmem:[%s998_s15 + $0x10] sm:$0xff] %v546_v4  ;;  %v406_v12 = vadd.f32 %v989_v45, %v405_v10 }
  0xf8   : > { %594 = vst [vmem:[%s998_s15 + $0x90] sm:$0xff] %v562_v5  ;;  %v486_v13 = vadd.f32 %v989_v45, %v485_v11  ;;  %v549_v14 = vmax.f32 %v411_v8, 0.0 }
  0xf9   : > { %v565_v15 = vmax.f32 %v491_v9, 0.0  ;;  %v548_v16 = vmax.f32 %v406_v12, 0.0  ;;  %v778_v18 = vpop.f32.mrb[6].mxu0 }
  0xfa   : > { %v564_v17 = vmax.f32 %v486_v13, 0.0  ;;  %v802_v19 = vpop.f32.mrb[6].mxu1  ;;  %581 = vst [vmem:[%s998_s15 + $0x28] sm:$0xff] %v549_v14  ;;  %v421_v20 = vadd.f32 %v778_v18, %v989_v45  ;;  %v415_v22 = vpop.f32.mrb[7].mxu0 }
  0xfb   : > { %597 = vst [vmem:[%s998_s15 + $0xa8] sm:$0xff] %v565_v15  ;;  %v501_v21 = vadd.f32 %v802_v19, %v989_v45  ;;  %v495_v23 = vpop.f32.mrb[7].mxu1  ;;  %580 = vst [vmem:[%s998_s15 + $0x20] sm:$0xff] %v548_v16  ;;  %v416_v24 = vadd.f32 %v989_v45, %v415_v22 }
  0xfc   : > { %596 = vst [vmem:[%s998_s15 + $0xa0] sm:$0xff] %v564_v17  ;;  %v496_v25 = vadd.f32 %v989_v45, %v495_v23  ;;  %v551_v26 = vmax.f32 %v421_v20, 0.0 }
  0xfd   : > { %v567_v27 = vmax.f32 %v501_v21, 0.0  ;;  %v550_v28 = vmax.f32 %v416_v24, 0.0  ;;  %v781_v30 = vpop.f32.mrb[8].mxu0 }
  0xfe   : > { %v566_v29 = vmax.f32 %v496_v25, 0.0  ;;  %v805_v31 = vpop.f32.mrb[8].mxu1  ;;  %583 = vst [vmem:[%s998_s15 + $0x38] sm:$0xff] %v551_v26  ;;  %v431_v32 = vadd.f32 %v781_v30, %v989_v45  ;;  %v425_v34 = vpop.f32.mrb[9].mxu0 }
  0xff   : > { %599 = vst [vmem:[%s998_s15 + $0xb8] sm:$0xff] %v567_v27  ;;  %v511_v33 = vadd.f32 %v805_v31, %v989_v45  ;;  %v505_v35 = vpop.f32.mrb[9].mxu1  ;;  %582 = vst [vmem:[%s998_s15 + $0x30] sm:$0xff] %v550_v28  ;;  %v426_v36 = vadd.f32 %v989_v45, %v425_v34 }
 0x100   : > { %598 = vst [vmem:[%s998_s15 + $0xb0] sm:$0xff] %v566_v29  ;;  %v506_v37 = vadd.f32 %v989_v45, %v505_v35  ;;  %v553_v38 = vmax.f32 %v431_v32, 0.0 }
 0x101   : > { %v569_v39 = vmax.f32 %v511_v33, 0.0  ;;  %v552_v40 = vmax.f32 %v426_v36, 0.0  ;;  %v784_v42 = vpop.f32.mrb[10].mxu0 }
 0x102   : > { %v568_v41 = vmax.f32 %v506_v37, 0.0  ;;  %v808_v43 = vpop.f32.mrb[10].mxu1  ;;  %585 = vst [vmem:[%s998_s15 + $0x48] sm:$0xff] %v553_v38  ;;  %v441_v44 = vadd.f32 %v784_v42, %v989_v45  ;;  %v435_v47 = vpop.f32.mrb[11].mxu0 }
 0x103   : > { %601 = vst [vmem:[%s998_s15 + $0xc8] sm:$0xff] %v569_v39  ;;  %v521_v46 = vadd.f32 %v808_v43, %v989_v45  ;;  %v515_v48 = vpop.f32.mrb[11].mxu1  ;;  %584 = vst [vmem:[%s998_s15 + $0x40] sm:$0xff] %v552_v40  ;;  %v436_v49 = vadd.f32 %v989_v45, %v435_v47 }
 0x104   : > { %600 = vst [vmem:[%s998_s15 + $0xc0] sm:$0xff] %v568_v41  ;;  %v516_v50 = vadd.f32 %v989_v45, %v515_v48  ;;  %v555_v51 = vmax.f32 %v441_v44, 0.0 }
 0x105   : > { %v571_v52 = vmax.f32 %v521_v46, 0.0  ;;  %v554_v53 = vmax.f32 %v436_v49, 0.0  ;;  %v787_v55 = vpop.f32.mrb[12].mxu0 }
 0x106   : > { %v570_v54 = vmax.f32 %v516_v50, 0.0  ;;  %v811_v56 = vpop.f32.mrb[12].mxu1  ;;  %587 = vst [vmem:[%s998_s15 + $0x58] sm:$0xff] %v555_v51  ;;  %v451_v57 = vadd.f32 %v787_v55, %v989_v45  ;;  %v445_v59 = vpop.f32.mrb[13].mxu0 }
 0x107   : > { %603 = vst [vmem:[%s998_s15 + $0xd8] sm:$0xff] %v571_v52  ;;  %v531_v58 = vadd.f32 %v811_v56, %v989_v45  ;;  %v525_v60 = vpop.f32.mrb[13].mxu1  ;;  %586 = vst [vmem:[%s998_s15 + $0x50] sm:$0xff] %v554_v53  ;;  %v446_v61 = vadd.f32 %v989_v45, %v445_v59 }
 0x108   : > { %602 = vst [vmem:[%s998_s15 + $0xd0] sm:$0xff] %v570_v54  ;;  %v526_v62 = vadd.f32 %v989_v45, %v525_v60  ;;  %v557_v63 = vmax.f32 %v451_v57, 0.0 }
 0x109   : > { %v573_v0 = vmax.f32 %v531_v58, 0.0  ;;  %v556_v1 = vmax.f32 %v446_v61, 0.0  ;;  %v790_v3 = vpop.f32.mrb[14].mxu0 }
 0x10a   : > { %v572_v2 = vmax.f32 %v526_v62, 0.0  ;;  %v814_v4 = vpop.f32.mrb[14].mxu1  ;;  %589 = vst [vmem:[%s998_s15 + $0x68] sm:$0xff] %v557_v63  ;;  %v461_v5 = vadd.f32 %v790_v3, %v989_v45  ;;  %v455_v7 = vpop.f32.mrb[15].mxu0 }
 0x10b   : > { %605 = vst [vmem:[%s998_s15 + $0xe8] sm:$0xff] %v573_v0  ;;  %v541_v6 = vadd.f32 %v814_v4, %v989_v45  ;;  %v535_v8 = vpop.f32.mrb[15].mxu1  ;;  %588 = vst [vmem:[%s998_s15 + $0x60] sm:$0xff] %v556_v1  ;;  %v456_v9 = vadd.f32 %v989_v45, %v455_v7 }
 0x10c   : > { %604 = vst [vmem:[%s998_s15 + $0xe0] sm:$0xff] %v572_v2  ;;  %v536_v10 = vadd.f32 %v989_v45, %v535_v8  ;;  %v559_v11 = vmax.f32 %v461_v5, 0.0 }
 0x10d   : > { %v575_v12 = vmax.f32 %v541_v6, 0.0  ;;  %v558_v13 = vmax.f32 %v456_v9, 0.0 }
 0x10e   : > { %v574_v14 = vmax.f32 %v536_v10, 0.0  ;;  %591 = vst [vmem:[%s998_s15 + $0x78] sm:$0xff] %v559_v11 }
 0x10f   : > { %607 = vst [vmem:[%s998_s15 + $0xf8] sm:$0xff] %v575_v12  ;;  %590 = vst [vmem:[%s998_s15 + $0x70] sm:$0xff] %v558_v13 }
 0x110   : > { %606 = vst [vmem:[%s998_s15 + $0xf0] sm:$0xff] %v574_v14 }
 0x111 PF: > { %s13_s12 = sadd.s32 1, %s855_s12  }
 0x112   : > { %p10_p4 = scmp.ge.s32.totalorder %s13_s12, 4  }
 0x114   :  { %12 = sbr.rel (!%p10_p4) target bundleno = 1 (0x1), region = 62 }

</bundles_post_ra>
